<compile_context>
chip_gen: v6e
topology: v6e:2x2x1
jax: 0.10.0
libtpu: 0.0.40
codegen_flags: <defaults>
</compile_context>

<pallas_src>
import jax
import jax.numpy as jnp
from jax.experimental import pallas as pl
from jax.experimental.pallas import tpu as pltpu

HIDDEN = 512
N_BLOCKS = 4          # 4 x (Linear + BN + PReLU), then final Linear(512, 1)
BN_EPS = 1e-5
LANE = 128            # lane-dense padding for the final 512 -> 1 projection


def domain_classifier_kernel(x_ref,    # (N, 512)      VMEM f32 (resident)
                             w_ref,    # (1, 512, 512) VMEM bf16 (layer l, pipelined)
                             b_ref,    # (1, 1, 512)   VMEM f32 (layer l)
                             g_ref,    # (1, 1, 512)   VMEM f32 (layer l)
                             bt_ref,   # (1, 1, 512)   VMEM f32 (layer l)
                             a_ref,    # (1, 1, 1)     VMEM f32 (PReLU slope, layer l)
                             w5_ref,   # (512, 128)    VMEM bf16 (zero-padded)
                             b5_ref,   # (1, 128)      VMEM f32  (zero-padded)
                             o_ref,    # (N, 128)      VMEM f32
                             h_ref):   # (N, 512)      VMEM f32 scratch (persistent)
    l = pl.program_id(0)

    # Load the input batch into the persistent activation scratch on step 0.
    @pl.when(l == 0)
    def _():
        h_ref[...] = x_ref[...]

    h = h_ref[...]

    # Linear: bf16 MXU matmul, f32 accumulation.
    z = jnp.dot(h.astype(jnp.bfloat16), w_ref[0],
                preferred_element_type=jnp.float32) + b_ref[0]

    # BatchNorm1d with batch statistics (biased variance), folded epilogue:
    # one subtract to center, then a single mul + add for normalize + affine.
    mean = jnp.mean(z, axis=0, keepdims=True)
    zc = z - mean
    var = jnp.mean(zc * zc, axis=0, keepdims=True)
    scale = g_ref[0] * jax.lax.rsqrt(var + BN_EPS)
    zn = zc * scale + bt_ref[0]

    # PReLU with a single shared slope per layer (fused as a mul by 1 or a).
    slope = a_ref[0]                     # (1, 1) broadcast
    h_new = zn * jnp.where(zn >= 0.0, jnp.float32(1.0), slope)
    h_ref[...] = h_new

    # Final Linear(512, 1), done lane-dense (padded to 128 output columns).
    @pl.when(l == pl.num_programs(0) - 1)
    def _():
        y = jnp.dot(h_new.astype(jnp.bfloat16), w5_ref[...],
                    preferred_element_type=jnp.float32) + b5_ref[...]
        o_ref[...] = y


@jax.jit
def domain_classifier(x, W, B, G, Bt, A, W5, b5):
    N = x.shape[0]
    x = x.astype(jnp.float32)
    W_bf = W.astype(jnp.bfloat16)
    A3 = A.astype(jnp.float32).reshape(N_BLOCKS, 1, 1)

    # Lane-dense final projection: zero-pad the 1-wide output to 128 lanes.
    W5_pad = jnp.zeros((HIDDEN, LANE), jnp.bfloat16).at[:, :1].set(
        W5.astype(jnp.bfloat16))
    b5_pad = jnp.zeros((1, LANE), jnp.float32).at[:, :1].set(
        b5.astype(jnp.float32))

    flops = 2 * N * HIDDEN * HIDDEN * N_BLOCKS + 2 * N * HIDDEN * LANE
    bytes_accessed = (N_BLOCKS * HIDDEN * HIDDEN * 2     # bf16 layer weights
                      + HIDDEN * LANE * 2                # padded final weight
                      + 3 * N_BLOCKS * HIDDEN * 4        # bias / gamma / beta
                      + N * HIDDEN * 4                   # input batch
                      + (N + 1) * LANE * 4)              # output + padded bias

    grid_spec = pltpu.PrefetchScalarGridSpec(
        num_scalar_prefetch=0,
        grid=(N_BLOCKS,),
        in_specs=[
            pl.BlockSpec((N, HIDDEN), lambda l: (0, 0)),             # x (resident)
            pl.BlockSpec((1, HIDDEN, HIDDEN), lambda l: (l, 0, 0)),  # W[l] (pipelined)
            pl.BlockSpec((1, 1, HIDDEN), lambda l: (l, 0, 0)),       # B[l]
            pl.BlockSpec((1, 1, HIDDEN), lambda l: (l, 0, 0)),       # G[l]
            pl.BlockSpec((1, 1, HIDDEN), lambda l: (l, 0, 0)),       # Bt[l]
            pl.BlockSpec((1, 1, 1), lambda l: (l, 0, 0)),            # A[l]
            pl.BlockSpec((HIDDEN, LANE), lambda l: (0, 0)),          # W5 (resident)
            pl.BlockSpec((1, LANE), lambda l: (0, 0)),               # b5 (resident)
        ],
        out_specs=pl.BlockSpec((N, LANE), lambda l: (0, 0)),
        scratch_shapes=[pltpu.VMEM((N, HIDDEN), jnp.float32)],       # persistent h
    )

    out = pl.pallas_call(
        domain_classifier_kernel,
        out_shape=jax.ShapeDtypeStruct((N, LANE), jnp.float32),
        grid_spec=grid_spec,
        compiler_params=pltpu.CompilerParams(
            dimension_semantics=("arbitrary",)),
        cost_estimate=pl.CostEstimate(
            flops=flops,
            transcendentals=N_BLOCKS * HIDDEN,   # rsqrt per feature per layer
            bytes_accessed=bytes_accessed),
    )(x, W_bf, B, G, Bt, A3, W5_pad, b5_pad)

    return out[:, :1]


def reference(x, W, B, G, Bt, A, W5, b5):
    # Pure-JAX reference matching the kernel numerics: bf16 matmul inputs with
    # f32 accumulation, BatchNorm (batch stats) and PReLU in f32.
    h = x.astype(jnp.float32)
    for l in range(N_BLOCKS):
        z = jnp.dot(h.astype(jnp.bfloat16), W[l].astype(jnp.bfloat16),
                    preferred_element_type=jnp.float32) + B[l]
        mean = jnp.mean(z, axis=0, keepdims=True)
        zc = z - mean
        var = jnp.mean(zc * zc, axis=0, keepdims=True)
        z = zc * (G[l] * jax.lax.rsqrt(var + BN_EPS)) + Bt[l]
        h = z * jnp.where(z >= 0.0, 1.0, A[l])
    return jnp.dot(h.astype(jnp.bfloat16), W5.astype(jnp.bfloat16),
                   preferred_element_type=jnp.float32) + b5


if __name__ == "__main__":
    key = jax.random.PRNGKey(0)
    N = 8  # batch size (>= 2 required for batch-stat BatchNorm; multiple of 8)

    k = jax.random.split(key, 8)
    x = jax.random.normal(k[0], (N, HIDDEN), dtype=jnp.float32)

    # Deterministic synthetic parameters (shapes match the nn.Module __init__;
    # Linear weights already transposed to (in, out)).
    scale = 1.0 / jnp.sqrt(jnp.float32(HIDDEN))
    W = jax.random.normal(k[1], (N_BLOCKS, HIDDEN, HIDDEN), dtype=jnp.float32) * scale
    B = jax.random.normal(k[2], (N_BLOCKS, 1, HIDDEN), dtype=jnp.float32) * 0.1
    G = 1.0 + 0.1 * jax.random.normal(k[3], (N_BLOCKS, 1, HIDDEN), dtype=jnp.float32)
    Bt = 0.1 * jax.random.normal(k[4], (N_BLOCKS, 1, HIDDEN), dtype=jnp.float32)
    A = jnp.full((N_BLOCKS,), 0.25, dtype=jnp.float32)  # PReLU default init
    W5 = jax.random.normal(k[5], (HIDDEN, 1), dtype=jnp.float32) * scale
    b5 = jax.random.normal(k[6], (1, 1), dtype=jnp.float32) * 0.1

    y = domain_classifier(x, W, B, G, Bt, A, W5, b5)
    y = jax.block_until_ready(y)

    y_ref = reference(x, W, B, G, Bt, A, W5, b5)
    assert y.shape == (N, 1)
    assert jnp.allclose(y, y_ref, rtol=1e-3, atol=1e-3), (y, y_ref)

    print("KERNEL_OK")
</pallas_src>

<mosaic_0001>
module attributes {stable_mosaic.version = 11 : i64} {
  func.func @domain_classifier_kernel(%arg0: i32, %arg1: memref<8x512xf32, #tpu.memory_space<vmem>>, %arg2: memref<1x512x512xbf16, #tpu.memory_space<vmem>>, %arg3: memref<1x1x512xf32, #tpu.memory_space<vmem>>, %arg4: memref<1x1x512xf32, #tpu.memory_space<vmem>>, %arg5: memref<1x1x512xf32, #tpu.memory_space<vmem>>, %arg6: memref<1x1x1xf32, #tpu.memory_space<vmem>>, %arg7: memref<512x128xbf16, #tpu.memory_space<vmem>>, %arg8: memref<1x128xf32, #tpu.memory_space<vmem>>, %arg9: memref<8x128xf32, #tpu.memory_space<vmem>>, %arg10: memref<8x512xf32, #tpu.memory_space<vmem>>) attributes {dimension_semantics = [#tpu.dimension_semantics<arbitrary>], iteration_bounds = array<i64: 4>, scalar_prefetch = 0 : i64, scratch_operands = 1 : i64, tpu.core_type = #tpu.core_type<tc>, window_params = [{pipeline_mode = #tpu.pipeline_mode<synchronous>, transform_indices = @transform_0, window_bounds = array<i64: 8, 512>}, {transform_indices = @transform_1, window_bounds = array<i64: 1, 512, 512>}, {transform_indices = @transform_2, window_bounds = array<i64: 1, 1, 512>}, {transform_indices = @transform_3, window_bounds = array<i64: 1, 1, 512>}, {transform_indices = @transform_4, window_bounds = array<i64: 1, 1, 512>}, {transform_indices = @transform_5, window_bounds = array<i64: 1, 1, 1>}, {pipeline_mode = #tpu.pipeline_mode<synchronous>, transform_indices = @transform_6, window_bounds = array<i64: 512, 128>}, {pipeline_mode = #tpu.pipeline_mode<synchronous>, transform_indices = @transform_7, window_bounds = array<i64: 1, 128>}, {pipeline_mode = #tpu.pipeline_mode<synchronous>, transform_indices = @transform_8, window_bounds = array<i64: 8, 128>}]} {
    %c0_i32 = arith.constant 0 : i32
    %0 = arith.cmpi eq, %arg0, %c0_i32 : i32
    %1 = arith.extui %0 : i1 to i32
    %c0_i32_0 = arith.constant 0 : i32
    %2 = arith.cmpi ne, %1, %c0_i32_0 : i32
    scf.if %2 {
      %c0_27 = arith.constant 0 : index
      %c0_28 = arith.constant 0 : index
      %48 = vector.load %arg1[%c0_27, %c0_28] : memref<8x512xf32, #tpu.memory_space<vmem>>, vector<8x512xf32>
      %c0_29 = arith.constant 0 : index
      %c0_30 = arith.constant 0 : index
      %49 = vector.load %arg10[%c0_29, %c0_30] : memref<8x512xf32, #tpu.memory_space<vmem>>, vector<8x512xf32>
      tpu.vector_store %arg10[%c0_29, %c0_30], %48 {strides = array<i32>} : memref<8x512xf32, #tpu.memory_space<vmem>>, vector<8x512xf32>,
    } else {
    }
    %c0 = arith.constant 0 : index
    %c0_1 = arith.constant 0 : index
    %3 = vector.load %arg10[%c0, %c0_1] : memref<8x512xf32, #tpu.memory_space<vmem>>, vector<8x512xf32>
    %4 = arith.truncf %3 : vector<8x512xf32> to vector<8x512xbf16>
    %c0_2 = arith.constant 0 : index
    %c0_3 = arith.constant 0 : index
    %c0_4 = arith.constant 0 : index
    %5 = vector.load %arg2[%c0_2, %c0_3, %c0_4] : memref<1x512x512xbf16, #tpu.memory_space<vmem>>, vector<1x512x512xbf16>
    %6 = vector.shape_cast %5 : vector<1x512x512xbf16> to vector<512x512xbf16>
    %cst = arith.constant dense<0.000000e+00> : vector<8x512xf32>
    %7 = tpu.matmul %4, %6, %cst {dimension_numbers = #tpu.dot_dimension_numbers<[1], [0], [0], [1], [0, 0, 1, 1], [], []>} : vector<8x512xbf16>, vector<512x512xbf16>, vector<8x512xf32> -> vector<8x512xf32>
    %c0_5 = arith.constant 0 : index
    %c0_6 = arith.constant 0 : index
    %c0_7 = arith.constant 0 : index
    %8 = vector.load %arg3[%c0_5, %c0_6, %c0_7] : memref<1x1x512xf32, #tpu.memory_space<vmem>>, vector<1x1x512xf32>
    %9 = vector.shape_cast %8 : vector<1x1x512xf32> to vector<1x512xf32>
    %10 = vector.broadcast %9 : vector<1x512xf32> to vector<8x512xf32>
    %11 = arith.addf %7, %10 : vector<8x512xf32>
    %cst_8 = arith.constant dense<0.000000e+00> : vector<512xf32>
    %12 = vector.multi_reduction <add>, %11, %cst_8 [0] : vector<8x512xf32> to vector<512xf32>
    %13 = vector.shape_cast %12 : vector<512xf32> to vector<1x512xf32>
    %cst_9 = arith.constant 8.000000e+00 : f32
    %14 = vector.broadcast %cst_9 : f32 to vector<1x512xf32>
    %15 = arith.divf %13, %14 : vector<1x512xf32>
    %16 = vector.broadcast %15 : vector<1x512xf32> to vector<8x512xf32>
    %17 = arith.subf %11, %16 : vector<8x512xf32>
    %18 = arith.mulf %17, %17 : vector<8x512xf32>
    %cst_10 = arith.constant dense<0.000000e+00> : vector<512xf32>
    %19 = vector.multi_reduction <add>, %18, %cst_10 [0] : vector<8x512xf32> to vector<512xf32>
    %20 = vector.shape_cast %19 : vector<512xf32> to vector<1x512xf32>
    %cst_11 = arith.constant 8.000000e+00 : f32
    %21 = vector.broadcast %cst_11 : f32 to vector<1x512xf32>
    %22 = arith.divf %20, %21 : vector<1x512xf32>
    %c0_12 = arith.constant 0 : index
    %c0_13 = arith.constant 0 : index
    %c0_14 = arith.constant 0 : index
    %23 = vector.load %arg4[%c0_12, %c0_13, %c0_14] : memref<1x1x512xf32, #tpu.memory_space<vmem>>, vector<1x1x512xf32>
    %24 = vector.shape_cast %23 : vector<1x1x512xf32> to vector<1x512xf32>
    %cst_15 = arith.constant 9.99999974E-6 : f32
    %25 = vector.broadcast %cst_15 : f32 to vector<1x512xf32>
    %26 = arith.addf %22, %25 : vector<1x512xf32>
    %27 = math.rsqrt %26 : vector<1x512xf32>
    %28 = arith.mulf %24, %27 : vector<1x512xf32>
    %29 = vector.broadcast %28 : vector<1x512xf32> to vector<8x512xf32>
    %30 = arith.mulf %17, %29 : vector<8x512xf32>
    %c0_16 = arith.constant 0 : index
    %c0_17 = arith.constant 0 : index
    %c0_18 = arith.constant 0 : index
    %31 = vector.load %arg5[%c0_16, %c0_17, %c0_18] : memref<1x1x512xf32, #tpu.memory_space<vmem>>, vector<1x1x512xf32>
    %32 = vector.shape_cast %31 : vector<1x1x512xf32> to vector<1x512xf32>
    %33 = vector.broadcast %32 : vector<1x512xf32> to vector<8x512xf32>
    %34 = arith.addf %30, %33 : vector<8x512xf32>
    %c0_19 = arith.constant 0 : index
    %c0_20 = arith.constant 0 : index
    %c0_21 = arith.constant 0 : index
    %35 = vector.load %arg6[%c0_19, %c0_20, %c0_21] : memref<1x1x1xf32, #tpu.memory_space<vmem>>, vector<1x1x1xf32>
    %36 = vector.shape_cast %35 : vector<1x1x1xf32> to vector<1x1xf32>
    %cst_22 = arith.constant 0.000000e+00 : f32
    %37 = vector.broadcast %cst_22 : f32 to vector<8x512xf32>
    %38 = arith.cmpf oge, %34, %37 : vector<8x512xf32>
    %cst_23 = arith.constant 1.000000e+00 : f32
    %39 = vector.broadcast %cst_23 : f32 to vector<8x512xf32>
    %40 = vector.shape_cast %36 : vector<1x1xf32> to vector<1x1xf32>
    %41 = vector.broadcast %40 : vector<1x1xf32> to vector<8x512xf32>
    %42 = arith.select %38, %39, %41 : vector<8x512xi1>, vector<8x512xf32>
    %43 = arith.mulf %34, %42 : vector<8x512xf32>
    %c0_24 = arith.constant 0 : index
    %c0_25 = arith.constant 0 : index
    %44 = vector.load %arg10[%c0_24, %c0_25] : memref<8x512xf32, #tpu.memory_space<vmem>>, vector<8x512xf32>
    tpu.vector_store %arg10[%c0_24, %c0_25], %43 {strides = array<i32>} : memref<8x512xf32, #tpu.memory_space<vmem>>, vector<8x512xf32>,
    %c3_i32 = arith.constant 3 : i32
    %45 = arith.cmpi eq, %arg0, %c3_i32 : i32
    %46 = arith.extui %45 : i1 to i32
    %c0_i32_26 = arith.constant 0 : i32
    %47 = arith.cmpi ne, %46, %c0_i32_26 : i32
    scf.if %47 {
      %48 = arith.truncf %43 : vector<8x512xf32> to vector<8x512xbf16>
      %c0_27 = arith.constant 0 : index
      %c0_28 = arith.constant 0 : index
      %49 = vector.load %arg7[%c0_27, %c0_28] : memref<512x128xbf16, #tpu.memory_space<vmem>>, vector<512x128xbf16>
      %cst_29 = arith.constant dense<0.000000e+00> : vector<8x128xf32>
      %50 = tpu.matmul %48, %49, %cst_29 {dimension_numbers = #tpu.dot_dimension_numbers<[1], [0], [0], [1], [0, 0, 1, 1], [], []>} : vector<8x512xbf16>, vector<512x128xbf16>, vector<8x128xf32> -> vector<8x128xf32>
      %c0_30 = arith.constant 0 : index
      %c0_31 = arith.constant 0 : index
      %51 = vector.load %arg8[%c0_30, %c0_31] : memref<1x128xf32, #tpu.memory_space<vmem>>, vector<1x128xf32>
      %52 = vector.broadcast %51 : vector<1x128xf32> to vector<8x128xf32>
      %53 = arith.addf %50, %52 : vector<8x128xf32>
      %c0_32 = arith.constant 0 : index
      %c0_33 = arith.constant 0 : index
      %54 = vector.load %arg9[%c0_32, %c0_33] : memref<8x128xf32, #tpu.memory_space<vmem>>, vector<8x128xf32>
      tpu.vector_store %arg9[%c0_32, %c0_33], %53 {strides = array<i32>} : memref<8x128xf32, #tpu.memory_space<vmem>>, vector<8x128xf32>,
    } else {
    }
    return
  }
  func.func @transform_0(%arg0: i32) -> (i32, i32) {
    %c0_i32 = arith.constant 0 : i32
    %c0_i32_0 = arith.constant 0 : i32
    %c0_i32_1 = arith.constant 0 : i32
    return %c0_i32, %c0_i32_0 : i32, i32
  }
  func.func @transform_1(%arg0: i32) -> (i32, i32, i32) {
    %c0_i32 = arith.constant 0 : i32
    %c0_i32_0 = arith.constant 0 : i32
    %c0_i32_1 = arith.constant 0 : i32
    return %arg0, %c0_i32, %c0_i32_0 : i32, i32, i32
  }
  func.func @transform_2(%arg0: i32) -> (i32, i32, i32) {
    %c0_i32 = arith.constant 0 : i32
    %c0_i32_0 = arith.constant 0 : i32
    %c0_i32_1 = arith.constant 0 : i32
    return %arg0, %c0_i32, %c0_i32_0 : i32, i32, i32
  }
  func.func @transform_3(%arg0: i32) -> (i32, i32, i32) {
    %c0_i32 = arith.constant 0 : i32
    %c0_i32_0 = arith.constant 0 : i32
    %c0_i32_1 = arith.constant 0 : i32
    return %arg0, %c0_i32, %c0_i32_0 : i32, i32, i32
  }
  func.func @transform_4(%arg0: i32) -> (i32, i32, i32) {
    %c0_i32 = arith.constant 0 : i32
    %c0_i32_0 = arith.constant 0 : i32
    %c0_i32_1 = arith.constant 0 : i32
    return %arg0, %c0_i32, %c0_i32_0 : i32, i32, i32
  }
  func.func @transform_5(%arg0: i32) -> (i32, i32, i32) {
    %c0_i32 = arith.constant 0 : i32
    %c0_i32_0 = arith.constant 0 : i32
    %c0_i32_1 = arith.constant 0 : i32
    return %arg0, %c0_i32, %c0_i32_0 : i32, i32, i32
  }
  func.func @transform_6(%arg0: i32) -> (i32, i32) {
    %c0_i32 = arith.constant 0 : i32
    %c0_i32_0 = arith.constant 0 : i32
    %c0_i32_1 = arith.constant 0 : i32
    return %c0_i32, %c0_i32_0 : i32, i32
  }
  func.func @transform_7(%arg0: i32) -> (i32, i32) {
    %c0_i32 = arith.constant 0 : i32
    %c0_i32_0 = arith.constant 0 : i32
    %c0_i32_1 = arith.constant 0 : i32
    return %c0_i32, %c0_i32_0 : i32, i32
  }
  func.func @transform_8(%arg0: i32) -> (i32, i32) {
    %c0_i32 = arith.constant 0 : i32
    %c0_i32_0 = arith.constant 0 : i32
    %c0_i32_1 = arith.constant 0 : i32
    return %c0_i32, %c0_i32_0 : i32, i32
  }
}

</mosaic_0001>

<bundles_post_ra>
// kernel: domain_classifier.1
= control target key start
LH: loop header
LB: loop body
LE: loop exit
PB: predicated region body
PF: predicated region fallthrough
CT: control target
= control target key end

     0   :  { %s2455_s27 = smov 0   ;;  %s2829_s0 = inlined_call_operand.vmem [shape: f32[8,512], index: 0, kind: input, shape index: {}]   ;;  %s2830_s1 = inlined_call_operand.vmem [shape: bf16[4,512,512], index: 1, kind: input, shape index: {}]   ;;  %s2831_s2 = inlined_call_operand.vmem [shape: f32[4,1,512], index: 2, kind: input, shape index: {}]   ;;  %s2832_s3 = inlined_call_operand.vmem [shape: f32[4,1,512], index: 3, kind: input, shape index: {}]   ;;  %s2833_s4 = inlined_call_operand.vmem [shape: f32[4,1,512], index: 4, kind: input, shape index: {}]   ;;  %s2834_s5 = inlined_call_operand.vmem [shape: f32[4,1,1], index: 5, kind: input, shape index: {}]   ;;  %s2835_s6 = inlined_call_operand.vmem [shape: bf16[512,128], index: 6, kind: input, shape index: {}]   ;;  %s2836_s7 = inlined_call_operand.vmem [shape: f32[1,128], index: 7, kind: input, shape index: {}]   ;;  %s2837_s8 = inlined_call_operand.vmem [shape: f32[8,128], index: 8, kind: output, shape index: {}]  }
   0x1 LB: > { %s2461_s28 = sadd.s32 4294967295, %s2406_s27   ;;  %p1940_p0 = scmp.ge.s32.totalorder %s2406_s27, 1  ;;  %s2406_s27 = sphi %s2455_s27, %s18_s27  }
   0x2   : > { %p292_p1 = scmp.lt.s32.totalorder %s2406_s27, 5 }
   0x4   : > { %p293_p2 = pnand %p1940_p0, %p292_p1 }
   0x5   : > { %p336_p3 = scmp.lt.s32.totalorder (!%p293_p2), %s2461_s28, 3  ;;  %p1946_p4 = scmp.ne.s32.totalorder (!%p293_p2), %s2461_s28, 0 }
   0x6   : > { %296 = sbr.rel (%p293_p2) target bundleno = 654 (0x28e), region = 52 }
   0xb   : > { %s2467_s29 = scalar_select %p336_p3, %s2461_s28, 3 }
   0xc   : > { %360 = sbr.rel (%p1946_p4) target bundleno = 20 (0x14), region = 56 }
   0xd   : > { %s2112_s30 = sshll.u32 %s2467_s29, 10  ;;  %s2471_s9 = sshll.u32 %s2467_s29, 2 }
   0xe   : > { %s2476_s12 = scalar_lea.vmem %s2830_s1, %s2112_s30  ;;  %s344_s15 = scalar_lea.vmem %s2831_s2, %s2471_s9 }
   0xf   : > { %s348_s18 = scalar_lea.vmem %s2832_s3, %s2471_s9  ;;  %s352_s21 = scalar_lea.vmem %s2833_s4, %s2471_s9 }
  0x10   : > { %s355_s24 = scalar_lea.vmem %s2834_s5, %s2467_s29 }
  0x11   : > { %v361_v0 = vld [vmem:[%s2829_s0] sm:$0xff]  ;;  %v362_v1 = vld [vmem:[%s2829_s0 + $0x8] sm:$0xff]  ;;  %v363_v2 = vld [vmem:[%s2829_s0 + $0x10] sm:$0xff] }
  0x12   : > { %365 = vst [vmem:[#allocation2 + $0x10] sm:$0xff] %v361_v0  ;;  %366 = vst [vmem:[#allocation2] sm:$0xff] %v362_v1  ;;  %v364_v3 = vld [vmem:[%s2829_s0 + $0x18] sm:$0xff] }
  0x13   : > { %367 = vst [vmem:[#allocation2 + $0x18] sm:$0xff] %v363_v2  ;;  %368 = vst [vmem:[#allocation2 + $0x8] sm:$0xff] %v364_v3 }
  0x14 PF: > { %v2168_v4 = vld [vmem:[%s2476_s12 + $0xe4] ss:$16 sps:$4 sm:$0xff]   ;;  %v2172_v6 = vld [vmem:[%s2476_s12 + $0xe0] ss:$16 sps:$4 sm:$0xff]   ;;  %p2076_p5 = scmp.ne.s32.totalorder %s2461_s28, 3 }
  0x15   : > { %v2170_v5 = vld [vmem:[%s2476_s12 + $0x2e4] ss:$16 sps:$4 sm:$0xff]   ;;  %1167 = vmatprep.subr.bf16.mxu0 %v2168_v4  ;;  %v2173_v7 = vld [vmem:[%s2476_s12 + $0x2e0] ss:$16 sps:$4 sm:$0xff]  }
  0x16   : > { %1208 = vmatprep.subr.bf16.mxu1 %v2170_v5  ;;  %v2174_v8 = vld [vmem:[%s2476_s12 + $0xc4] ss:$16 sps:$4 sm:$0xff]   ;;  %1168 = vmatpush1.bf16.msra.mxu0 %v2172_v6  ;;  %v2178_v10 = vld [vmem:[%s2476_s12 + $0xc0] ss:$16 sps:$4 sm:$0xff]  }
  0x17   : > { %1209 = vmatpush1.bf16.msra.mxu1 %v2173_v7  ;;  %v2176_v9 = vld [vmem:[%s2476_s12 + $0x2c4] ss:$16 sps:$4 sm:$0xff]   ;;  %1169 = vmatprep.subr.bf16.mxu0 %v2174_v8  ;;  %v2179_v11 = vld [vmem:[%s2476_s12 + $0x2c0] ss:$16 sps:$4 sm:$0xff]  }
  0x18   : > { %1210 = vmatprep.subr.bf16.mxu1 %v2176_v9  ;;  %v2180_v12 = vld [vmem:[%s2476_s12 + $0xa4] ss:$16 sps:$4 sm:$0xff]   ;;  %v2184_v14 = vld [vmem:[%s2476_s12 + $0xa0] ss:$16 sps:$4 sm:$0xff]  }
  0x19   : > { %v2182_v13 = vld [vmem:[%s2476_s12 + $0x2a4] ss:$16 sps:$4 sm:$0xff]   ;;  %v2185_v15 = vld [vmem:[%s2476_s12 + $0x2a0] ss:$16 sps:$4 sm:$0xff]  }
  0x1a   : > { %1170 = vmatpush1.bf16.msra.mxu0 %v2178_v10  ;;  %v2186_v16 = vld [vmem:[%s2476_s12 + $0x84] ss:$16 sps:$4 sm:$0xff]   ;;  %v2190_v18 = vld [vmem:[%s2476_s12 + $0x80] ss:$16 sps:$4 sm:$0xff]   ;;  %v372_v54 = vld [vmem:[#allocation2 + $0x8] sm:$0xff] }
  0x1b   : > { %1211 = vmatpush1.bf16.msra.mxu1 %v2179_v11  ;;  %1171 = vmatprep.subr.bf16.mxu0 %v2180_v12  ;;  %v2188_v17 = vld [vmem:[%s2476_s12 + $0x284] ss:$16 sps:$4 sm:$0xff]   ;;  %v2191_v19 = vld [vmem:[%s2476_s12 + $0x280] ss:$16 sps:$4 sm:$0xff]   ;;  %v376_v56 = vpack.c.bf16 %v372_v54, %v372_v54  ;;  %v371_v9 = vld [vmem:[#allocation2 + $0x18] sm:$0xff] }
  0x1c   : > { %1212 = vmatprep.subr.bf16.mxu1 %v2182_v13  ;;  %v2192_v20 = vld [vmem:[%s2476_s12 + $0x64] ss:$16 sps:$4 sm:$0xff]   ;;  %v2196_v22 = vld [vmem:[%s2476_s12 + $0x60] ss:$16 sps:$4 sm:$0xff]   ;;  %v2266_v10 = vld [vmem:[%s2476_s12 + $0xec] ss:$16 sps:$4 sm:$0xff]   ;;  %v2578_v13 = vpack.c.bf16 %v371_v9, %v371_v9 }
  0x1d   : > { %v2194_v21 = vld [vmem:[%s2476_s12 + $0x264] ss:$16 sps:$4 sm:$0xff]   ;;  %v2197_v23 = vld [vmem:[%s2476_s12 + $0x260] ss:$16 sps:$4 sm:$0xff]   ;;  %1240 = vmatprep.mubr.bf16.mxu1 %v376_v56  ;;  %v2269_v11 = vld [vmem:[%s2476_s12 + $0x2ec] ss:$16 sps:$4 sm:$0xff]  }
  0x1e   : > { %1172 = vmatpush1.bf16.msra.mxu0 %v2184_v14  ;;  %v2198_v24 = vld [vmem:[%s2476_s12 + $0x44] ss:$16 sps:$4 sm:$0xff]   ;;  %v2202_v26 = vld [vmem:[%s2476_s12 + $0x40] ss:$16 sps:$4 sm:$0xff]   ;;  %v2264_v14 = vld [vmem:[%s2476_s12 + $0xe8] ss:$16 sps:$4 sm:$0xff]  }
  0x1f   : > { %1213 = vmatpush1.bf16.msra.mxu1 %v2185_v15  ;;  %1173 = vmatprep.subr.bf16.mxu0 %v2186_v16  ;;  %v2200_v25 = vld [vmem:[%s2476_s12 + $0x244] ss:$16 sps:$4 sm:$0xff]   ;;  %v2203_v27 = vld [vmem:[%s2476_s12 + $0x240] ss:$16 sps:$4 sm:$0xff]   ;;  %v2267_v15 = vld [vmem:[%s2476_s12 + $0x2e8] ss:$16 sps:$4 sm:$0xff]  }
  0x20   : > { %1214 = vmatprep.subr.bf16.mxu1 %v2188_v17  ;;  %v2204_v28 = vld [vmem:[%s2476_s12 + $0x24] ss:$16 sps:$4 sm:$0xff]   ;;  %v2208_v30 = vld [vmem:[%s2476_s12 + $0x20] ss:$16 sps:$4 sm:$0xff]   ;;  %v2272_v16 = vld [vmem:[%s2476_s12 + $0xcc] ss:$16 sps:$4 sm:$0xff]  }
  0x21   : > { %v2206_v29 = vld [vmem:[%s2476_s12 + $0x224] ss:$16 sps:$4 sm:$0xff]   ;;  %v2209_v31 = vld [vmem:[%s2476_s12 + $0x220] ss:$16 sps:$4 sm:$0xff]   ;;  %v2275_v17 = vld [vmem:[%s2476_s12 + $0x2cc] ss:$16 sps:$4 sm:$0xff]  }
  0x22   : > { %1174 = vmatpush1.bf16.msra.mxu0 %v2190_v18  ;;  %v2210_v32 = vld [vmem:[%s2476_s12 + $0x4] ss:$16 sps:$4 sm:$0xff]   ;;  %v2214_v34 = vld [vmem:[%s2476_s12] ss:$16 sps:$4 sm:$0xff]   ;;  %v2270_v18 = vld [vmem:[%s2476_s12 + $0xc8] ss:$16 sps:$4 sm:$0xff]  }
  0x23   : > { %1215 = vmatpush1.bf16.msra.mxu1 %v2191_v19  ;;  %1175 = vmatprep.subr.bf16.mxu0 %v2192_v20  ;;  %v2212_v33 = vld [vmem:[%s2476_s12 + $0x204] ss:$16 sps:$4 sm:$0xff]   ;;  %v2215_v35 = vld [vmem:[%s2476_s12 + $0x200] ss:$16 sps:$4 sm:$0xff]   ;;  %v2273_v19 = vld [vmem:[%s2476_s12 + $0x2c8] ss:$16 sps:$4 sm:$0xff]  }
  0x24   : > { %1216 = vmatprep.subr.bf16.mxu1 %v2194_v21  ;;  %v2216_v36 = vld [vmem:[%s2476_s12 + $0x1e4] ss:$16 sps:$4 sm:$0xff]   ;;  %v2220_v38 = vld [vmem:[%s2476_s12 + $0x1e0] ss:$16 sps:$4 sm:$0xff]   ;;  %v2278_v20 = vld [vmem:[%s2476_s12 + $0xac] ss:$16 sps:$4 sm:$0xff]  }
  0x25   : > { %v2218_v37 = vld [vmem:[%s2476_s12 + $0x3e4] ss:$16 sps:$4 sm:$0xff]   ;;  %v2221_v39 = vld [vmem:[%s2476_s12 + $0x3e0] ss:$16 sps:$4 sm:$0xff]   ;;  %v2281_v21 = vld [vmem:[%s2476_s12 + $0x2ac] ss:$16 sps:$4 sm:$0xff]  }
  0x26   : > { %1176 = vmatpush1.bf16.msra.mxu0 %v2196_v22  ;;  %v2222_v40 = vld [vmem:[%s2476_s12 + $0x1c4] ss:$16 sps:$4 sm:$0xff]   ;;  %v2226_v42 = vld [vmem:[%s2476_s12 + $0x1c0] ss:$16 sps:$4 sm:$0xff]   ;;  %v2276_v22 = vld [vmem:[%s2476_s12 + $0xa8] ss:$16 sps:$4 sm:$0xff]  }
  0x27   : > { %1217 = vmatpush1.bf16.msra.mxu1 %v2197_v23  ;;  %1177 = vmatprep.subr.bf16.mxu0 %v2198_v24  ;;  %v2224_v41 = vld [vmem:[%s2476_s12 + $0x3c4] ss:$16 sps:$4 sm:$0xff]   ;;  %v2227_v43 = vld [vmem:[%s2476_s12 + $0x3c0] ss:$16 sps:$4 sm:$0xff]   ;;  %v2279_v23 = vld [vmem:[%s2476_s12 + $0x2a8] ss:$16 sps:$4 sm:$0xff]  }
  0x28   : > { %1218 = vmatprep.subr.bf16.mxu1 %v2200_v25  ;;  %v2228_v44 = vld [vmem:[%s2476_s12 + $0x1a4] ss:$16 sps:$4 sm:$0xff]   ;;  %v2232_v46 = vld [vmem:[%s2476_s12 + $0x1a0] ss:$16 sps:$4 sm:$0xff]   ;;  %v2284_v24 = vld [vmem:[%s2476_s12 + $0x8c] ss:$16 sps:$4 sm:$0xff]  }
  0x29   : > { %v2230_v45 = vld [vmem:[%s2476_s12 + $0x3a4] ss:$16 sps:$4 sm:$0xff]   ;;  %v2233_v47 = vld [vmem:[%s2476_s12 + $0x3a0] ss:$16 sps:$4 sm:$0xff]   ;;  %v2287_v25 = vld [vmem:[%s2476_s12 + $0x28c] ss:$16 sps:$4 sm:$0xff]  }
  0x2a   : > { %1178 = vmatpush1.bf16.msra.mxu0 %v2202_v26  ;;  %v2234_v48 = vld [vmem:[%s2476_s12 + $0x184] ss:$16 sps:$4 sm:$0xff]   ;;  %v2238_v51 = vld [vmem:[%s2476_s12 + $0x180] ss:$16 sps:$4 sm:$0xff]   ;;  %v2282_v26 = vld [vmem:[%s2476_s12 + $0x88] ss:$16 sps:$4 sm:$0xff]  }
  0x2b   : > { %1219 = vmatpush1.bf16.msra.mxu1 %v2203_v27  ;;  %1179 = vmatprep.subr.bf16.mxu0 %v2204_v28  ;;  %v2236_v49 = vld [vmem:[%s2476_s12 + $0x384] ss:$16 sps:$4 sm:$0xff]   ;;  %v2239_v52 = vld [vmem:[%s2476_s12 + $0x380] ss:$16 sps:$4 sm:$0xff]   ;;  %v2285_v27 = vld [vmem:[%s2476_s12 + $0x288] ss:$16 sps:$4 sm:$0xff]  }
  0x2c   : > { %1220 = vmatprep.subr.bf16.mxu1 %v2206_v29  ;;  %v370_v50 = vld [vmem:[#allocation2] sm:$0xff]  ;;  %v369_v8 = vld [vmem:[#allocation2 + $0x10] sm:$0xff]  ;;  %v2290_v28 = vld [vmem:[%s2476_s12 + $0x6c] ss:$16 sps:$4 sm:$0xff]  }
  0x2d   : > { %v2555_v53 = vpack.c.bf16 %v370_v50, %v370_v50  ;;  %v2240_v55 = vld [vmem:[%s2476_s12 + $0x164] ss:$16 sps:$4 sm:$0xff]   ;;  %v2244_v58 = vld [vmem:[%s2476_s12 + $0x160] ss:$16 sps:$4 sm:$0xff]   ;;  %v2576_v12 = vpack.c.bf16 %v369_v8, %v369_v8  ;;  %v2293_v29 = vld [vmem:[%s2476_s12 + $0x26c] ss:$16 sps:$4 sm:$0xff]  }
  0x2e   : > { %1180 = vmatpush1.bf16.msra.mxu0 %v2208_v30  ;;  %v2242_v57 = vld [vmem:[%s2476_s12 + $0x364] ss:$16 sps:$4 sm:$0xff]   ;;  %v2245_v59 = vld [vmem:[%s2476_s12 + $0x360] ss:$16 sps:$4 sm:$0xff]   ;;  %v2288_v30 = vld [vmem:[%s2476_s12 + $0x68] ss:$16 sps:$4 sm:$0xff]  }
  0x2f   : > { %1221 = vmatpush1.bf16.msra.mxu1 %v2209_v31  ;;  %1181 = vmatprep.subr.bf16.mxu0 %v2210_v32  ;;  %v2246_v60 = vld [vmem:[%s2476_s12 + $0x144] ss:$16 sps:$4 sm:$0xff]   ;;  %v2250_v62 = vld [vmem:[%s2476_s12 + $0x140] ss:$16 sps:$4 sm:$0xff]   ;;  %v2291_v31 = vld [vmem:[%s2476_s12 + $0x268] ss:$16 sps:$4 sm:$0xff]  }
  0x30   : > { %1222 = vmatprep.subr.bf16.mxu1 %v2212_v33  ;;  %1199 = vmatprep.mubr.bf16.mxu0 %v2555_v53  ;;  %v2248_v61 = vld [vmem:[%s2476_s12 + $0x344] ss:$16 sps:$4 sm:$0xff]   ;;  %v2251_v63 = vld [vmem:[%s2476_s12 + $0x340] ss:$16 sps:$4 sm:$0xff]   ;;  %v2296_v32 = vld [vmem:[%s2476_s12 + $0x4c] ss:$16 sps:$4 sm:$0xff]  }
  0x31   : > { %v2252_v0 = vld [vmem:[%s2476_s12 + $0x124] ss:$16 sps:$4 sm:$0xff]   ;;  %v2256_v2 = vld [vmem:[%s2476_s12 + $0x120] ss:$16 sps:$4 sm:$0xff]   ;;  %v2299_v33 = vld [vmem:[%s2476_s12 + $0x24c] ss:$16 sps:$4 sm:$0xff]  }
  0x32   : > { %1182 = vmatpush1.bf16.msra.mxu0 %v2214_v34  ;;  %v2254_v1 = vld [vmem:[%s2476_s12 + $0x324] ss:$16 sps:$4 sm:$0xff]   ;;  %v2257_v3 = vld [vmem:[%s2476_s12 + $0x320] ss:$16 sps:$4 sm:$0xff]   ;;  %v2294_v34 = vld [vmem:[%s2476_s12 + $0x48] ss:$16 sps:$4 sm:$0xff]  }
  0x33   : > { %1223 = vmatpush1.bf16.msra.mxu1 %v2215_v35  ;;  %1183 = vmatprep.subr.bf16.mxu0 %v2216_v36  ;;  %v2258_v4 = vld [vmem:[%s2476_s12 + $0x104] ss:$16 sps:$4 sm:$0xff]   ;;  %v2262_v6 = vld [vmem:[%s2476_s12 + $0x100] ss:$16 sps:$4 sm:$0xff]   ;;  %v2297_v35 = vld [vmem:[%s2476_s12 + $0x248] ss:$16 sps:$4 sm:$0xff]  }
  0x34   : > { %1224 = vmatprep.subr.bf16.mxu1 %v2218_v37  ;;  %v2260_v5 = vld [vmem:[%s2476_s12 + $0x304] ss:$16 sps:$4 sm:$0xff]   ;;  %v2263_v7 = vld [vmem:[%s2476_s12 + $0x300] ss:$16 sps:$4 sm:$0xff]   ;;  %v2302_v36 = vld [vmem:[%s2476_s12 + $0x2c] ss:$16 sps:$4 sm:$0xff]  }
  0x35   : > { %v2305_v37 = vld [vmem:[%s2476_s12 + $0x22c] ss:$16 sps:$4 sm:$0xff]   ;;  %v2318_v50 = vld [vmem:[%s2476_s12 + $0x1c8] ss:$16 sps:$4 sm:$0xff]  }
  0x36   : > { %1184 = vmatpush2.bf16.msra.mxu0 %v2220_v38  ;;  %v2300_v38 = vld [vmem:[%s2476_s12 + $0x28] ss:$16 sps:$4 sm:$0xff]   ;;  %v2356_v8 = vld [vmem:[%s2476_s12 + $0x10c] ss:$16 sps:$4 sm:$0xff]  }
  0x37   : > { %1225 = vmatpush2.bf16.msra.mxu1 %v2221_v39  ;;  %1185 = vmatprep.subr.bf16.mxu0 %v2222_v40  ;;  %v2303_v39 = vld [vmem:[%s2476_s12 + $0x228] ss:$16 sps:$4 sm:$0xff]   ;;  %v2308_v40 = vld [vmem:[%s2476_s12 + $0xc] ss:$16 sps:$4 sm:$0xff]  }
  0x38   : > { %1226 = vmatprep.subr.bf16.mxu1 %v2224_v41  ;;  %v2311_v41 = vld [vmem:[%s2476_s12 + $0x20c] ss:$16 sps:$4 sm:$0xff]   ;;  %v2324_v54 = vld [vmem:[%s2476_s12 + $0x1a8] ss:$16 sps:$4 sm:$0xff]  }
  0x39   : > { %v2359_v9 = vld [vmem:[%s2476_s12 + $0x30c] ss:$16 sps:$4 sm:$0xff]  }
  0x3a   : > { %1186 = vmatpush2.bf16.msra.mxu0 %v2226_v42  ;;  %v2306_v42 = vld [vmem:[%s2476_s12 + $0x8] ss:$16 sps:$4 sm:$0xff]  }
  0x3b   : > { %1227 = vmatpush2.bf16.msra.mxu1 %v2227_v43  ;;  %1187 = vmatprep.subr.bf16.mxu0 %v2228_v44  ;;  %v2309_v43 = vld [vmem:[%s2476_s12 + $0x208] ss:$16 sps:$4 sm:$0xff]   ;;  %v2314_v44 = vld [vmem:[%s2476_s12 + $0x1ec] ss:$16 sps:$4 sm:$0xff]  }
  0x3c   : > { %1228 = vmatprep.subr.bf16.mxu1 %v2230_v45  ;;  %v2317_v45 = vld [vmem:[%s2476_s12 + $0x3ec] ss:$16 sps:$4 sm:$0xff]  }
  0x3e   : > { %1188 = vmatpush2.bf16.msra.mxu0 %v2232_v46  ;;  %v2312_v46 = vld [vmem:[%s2476_s12 + $0x1e8] ss:$16 sps:$4 sm:$0xff]  }
  0x3f   : > { %1229 = vmatpush2.bf16.msra.mxu1 %v2233_v47  ;;  %1189 = vmatprep.subr.bf16.mxu0 %v2234_v48  ;;  %v2315_v47 = vld [vmem:[%s2476_s12 + $0x3e8] ss:$16 sps:$4 sm:$0xff]   ;;  %v2320_v48 = vld [vmem:[%s2476_s12 + $0x1cc] ss:$16 sps:$4 sm:$0xff]  }
  0x40   : > { %1230 = vmatprep.subr.bf16.mxu1 %v2236_v49  ;;  %v2323_v49 = vld [vmem:[%s2476_s12 + $0x3cc] ss:$16 sps:$4 sm:$0xff]  }
  0x42   : > { %1190 = vmatpush2.bf16.msra.mxu0 %v2238_v51  ;;  %v2321_v51 = vld [vmem:[%s2476_s12 + $0x3c8] ss:$16 sps:$4 sm:$0xff]  }
  0x43   : > { %1231 = vmatpush2.bf16.msra.mxu1 %v2239_v52  ;;  %1191 = vmatprep.subr.bf16.mxu0 %v2240_v55  ;;  %v2326_v52 = vld [vmem:[%s2476_s12 + $0x1ac] ss:$16 sps:$4 sm:$0xff]   ;;  %v2327_v55 = vld [vmem:[%s2476_s12 + $0x3a8] ss:$16 sps:$4 sm:$0xff]  }
  0x44   : > { %1232 = vmatprep.subr.bf16.mxu1 %v2242_v57  ;;  %v2335_v57 = vld [vmem:[%s2476_s12 + $0x38c] ss:$16 sps:$4 sm:$0xff]  }
  0x46   : > { %1192 = vmatpush2.bf16.msra.mxu0 %v2244_v58  ;;  %v2330_v58 = vld [vmem:[%s2476_s12 + $0x188] ss:$16 sps:$4 sm:$0xff]  }
  0x47   : > { %1233 = vmatpush2.bf16.msra.mxu1 %v2245_v59  ;;  %1193 = vmatprep.subr.bf16.mxu0 %v2246_v60  ;;  %v2333_v59 = vld [vmem:[%s2476_s12 + $0x388] ss:$16 sps:$4 sm:$0xff]   ;;  %v2338_v60 = vld [vmem:[%s2476_s12 + $0x16c] ss:$16 sps:$4 sm:$0xff]  }
  0x48   : > { %1234 = vmatprep.subr.bf16.mxu1 %v2248_v61  ;;  %v2341_v61 = vld [vmem:[%s2476_s12 + $0x36c] ss:$16 sps:$4 sm:$0xff]  }
  0x4a   : > { %1194 = vmatpush2.bf16.msra.mxu0 %v2250_v62  ;;  %v2336_v62 = vld [vmem:[%s2476_s12 + $0x168] ss:$16 sps:$4 sm:$0xff]  }
  0x4b   : > { %1235 = vmatpush2.bf16.msra.mxu1 %v2251_v63  ;;  %1195 = vmatprep.subr.bf16.mxu0 %v2252_v0  ;;  %v2339_v63 = vld [vmem:[%s2476_s12 + $0x368] ss:$16 sps:$4 sm:$0xff]   ;;  %v2344_v0 = vld [vmem:[%s2476_s12 + $0x14c] ss:$16 sps:$4 sm:$0xff]  }
  0x4c   : > { %1236 = vmatprep.subr.bf16.mxu1 %v2254_v1  ;;  %v2347_v1 = vld [vmem:[%s2476_s12 + $0x34c] ss:$16 sps:$4 sm:$0xff]  }
  0x4e   : > { %1196 = vmatpush2.bf16.msra.mxu0 %v2256_v2  ;;  %v2342_v2 = vld [vmem:[%s2476_s12 + $0x148] ss:$16 sps:$4 sm:$0xff]  }
  0x4f   : > { %1237 = vmatpush2.bf16.msra.mxu1 %v2257_v3  ;;  %1197 = vmatprep.subr.bf16.mxu0 %v2258_v4  ;;  %v2345_v3 = vld [vmem:[%s2476_s12 + $0x348] ss:$16 sps:$4 sm:$0xff]   ;;  %v2350_v4 = vld [vmem:[%s2476_s12 + $0x12c] ss:$16 sps:$4 sm:$0xff]  }
  0x50   : > { %1238 = vmatprep.subr.bf16.mxu1 %v2260_v5  ;;  %v2353_v5 = vld [vmem:[%s2476_s12 + $0x32c] ss:$16 sps:$4 sm:$0xff]  }
  0x52   : > { %1198 = vmatpush2.bf16.msra.mxu0 %v2262_v6  ;;  %v2348_v6 = vld [vmem:[%s2476_s12 + $0x128] ss:$16 sps:$4 sm:$0xff]  }
  0x53   : > { %1239 = vmatpush2.bf16.msra.mxu1 %v2263_v7  ;;  %1249 = vmatprep.subr.bf16.mxu0 %v2266_v10  ;;  %v2351_v7 = vld [vmem:[%s2476_s12 + $0x328] ss:$16 sps:$4 sm:$0xff]  }
  0x54   : > { %1290 = vmatprep.subr.bf16.mxu1 %v2269_v11  ;;  %v2354_v10 = vld [vmem:[%s2476_s12 + $0x108] ss:$16 sps:$4 sm:$0xff]  }
  0x55   : > { %1200 = vmatmul.mubr.bf16.vlgmr.msra.gmra.mxu0 %v2576_v12  ;;  %v2357_v11 = vld [vmem:[%s2476_s12 + $0x308] ss:$16 sps:$4 sm:$0xff]  }
  0x56   : > { %1241 = vmatmul.mubr.bf16.vlgmr.msra.gmra.mxu1 %v2578_v13  ;;  %1250 = vmatpush1.bf16.msra.mxu0 %v2264_v14  ;;  %v2408_v14 = vmov 0  }
  0x57   : > { %1291 = vmatpush1.bf16.msra.mxu1 %v2267_v15  ;;  %1251 = vmatprep.subr.bf16.mxu0 %v2272_v16  ;;  %v2075_v15 = vld [vmem:[%s355_s24] ss:$0 sm:$0xff]  ;;  %v507_v16 = vlaneseq }
  0x58   : > { %1292 = vmatprep.subr.bf16.mxu1 %v2275_v17  ;;  %1281 = vmatprep.mubr.bf16.mxu0 %v2555_v53  ;;  %v2329_v53 = vld [vmem:[%s2476_s12 + $0x3ac] ss:$16 sps:$4 sm:$0xff]  }
  0x59   : > { %1322 = vmatprep.mubr.bf16.mxu1 %v376_v56  ;;  %v2332_v56 = vld [vmem:[%s2476_s12 + $0x18c] ss:$16 sps:$4 sm:$0xff]   ;;  %2167 = vset.pattern.permute.xlu0 %v2408_v14  ;;  %v2652_v17 = vshrl.u32 %v507_v16, 7 }
  0x5a   : > { %1252 = vmatpush1.bf16.msra.mxu0 %v2270_v18  ;;  %1497 = vperm.xlu0 %2167, %v2075_v15  }
  0x5b   : > { %1293 = vmatpush1.bf16.msra.mxu1 %v2273_v19  ;;  %1253 = vmatprep.subr.bf16.mxu0 %v2278_v20  ;;  %v2655_v18 = vsub.s32 0, %v2652_v17 }
  0x5c   : > { %1294 = vmatprep.subr.bf16.mxu1 %v2281_v21 }
  0x5e   : > { %1254 = vmatpush1.bf16.msra.mxu0 %v2276_v22 }
  0x5f   : > { %1295 = vmatpush1.bf16.msra.mxu1 %v2279_v23  ;;  %1255 = vmatprep.subr.bf16.mxu0 %v2284_v24 }
  0x60   : > { %1296 = vmatprep.subr.bf16.mxu1 %v2287_v25 }
  0x62   : > { %1256 = vmatpush1.bf16.msra.mxu0 %v2282_v26 }
  0x63   : > { %1297 = vmatpush1.bf16.msra.mxu1 %v2285_v27  ;;  %1257 = vmatprep.subr.bf16.mxu0 %v2290_v28 }
  0x64   : > { %1298 = vmatprep.subr.bf16.mxu1 %v2293_v29 }
  0x66   : > { %1258 = vmatpush1.bf16.msra.mxu0 %v2288_v30 }
  0x67   : > { %1299 = vmatpush1.bf16.msra.mxu1 %v2291_v31  ;;  %1259 = vmatprep.subr.bf16.mxu0 %v2296_v32 }
  0x68   : > { %1300 = vmatprep.subr.bf16.mxu1 %v2299_v33 }
  0x6a   : > { %1260 = vmatpush1.bf16.msra.mxu0 %v2294_v34 }
  0x6b   : > { %1301 = vmatpush1.bf16.msra.mxu1 %v2297_v35  ;;  %1261 = vmatprep.subr.bf16.mxu0 %v2302_v36 }
  0x6c   : > { %1302 = vmatprep.subr.bf16.mxu1 %v2305_v37 }
  0x6e   : > { %1262 = vmatpush1.bf16.msra.mxu0 %v2300_v38 }
  0x6f   : > { %1303 = vmatpush1.bf16.msra.mxu1 %v2303_v39  ;;  %1263 = vmatprep.subr.bf16.mxu0 %v2308_v40 }
  0x70   : > { %1304 = vmatprep.subr.bf16.mxu1 %v2311_v41 }
  0x72   : > { %1264 = vmatpush1.bf16.msra.mxu0 %v2306_v42 }
  0x73   : > { %1305 = vmatpush1.bf16.msra.mxu1 %v2309_v43  ;;  %1265 = vmatprep.subr.bf16.mxu0 %v2314_v44 }
  0x74   : > { %1306 = vmatprep.subr.bf16.mxu1 %v2317_v45 }
  0x76   : > { %1266 = vmatpush2.bf16.msra.mxu0 %v2312_v46 }
  0x77   : > { %1307 = vmatpush2.bf16.msra.mxu1 %v2315_v47  ;;  %1267 = vmatprep.subr.bf16.mxu0 %v2320_v48 }
  0x78   : > { %1308 = vmatprep.subr.bf16.mxu1 %v2323_v49 }
  0x7a   : > { %1268 = vmatpush2.bf16.msra.mxu0 %v2318_v50 }
  0x7b   : > { %1309 = vmatpush2.bf16.msra.mxu1 %v2321_v51  ;;  %1269 = vmatprep.subr.bf16.mxu0 %v2326_v52 }
  0x7c   : > { %1310 = vmatprep.subr.bf16.mxu1 %v2329_v53 }
  0x7e   : > { %1270 = vmatpush2.bf16.msra.mxu0 %v2324_v54 }
  0x7f   : > { %1311 = vmatpush2.bf16.msra.mxu1 %v2327_v55  ;;  %1271 = vmatprep.subr.bf16.mxu0 %v2332_v56 }
  0x80   : > { %1312 = vmatprep.subr.bf16.mxu1 %v2335_v57 }
  0x82   : > { %1272 = vmatpush2.bf16.msra.mxu0 %v2330_v58 }
  0x83   : > { %1313 = vmatpush2.bf16.msra.mxu1 %v2333_v59  ;;  %1273 = vmatprep.subr.bf16.mxu0 %v2338_v60 }
  0x84   : > { %1314 = vmatprep.subr.bf16.mxu1 %v2341_v61 }
  0x86   : > { %1274 = vmatpush2.bf16.msra.mxu0 %v2336_v62 }
  0x87   : > { %1315 = vmatpush2.bf16.msra.mxu1 %v2339_v63  ;;  %1275 = vmatprep.subr.bf16.mxu0 %v2344_v0 }
  0x88   : > { %1316 = vmatprep.subr.bf16.mxu1 %v2347_v1 }
  0x8a   : > { %1276 = vmatpush2.bf16.msra.mxu0 %v2342_v2 }
  0x8b   : > { %1317 = vmatpush2.bf16.msra.mxu1 %v2345_v3  ;;  %1277 = vmatprep.subr.bf16.mxu0 %v2350_v4 }
  0x8c   : > { %1318 = vmatprep.subr.bf16.mxu1 %v2353_v5 }
  0x8e   : > { %1278 = vmatpush2.bf16.msra.mxu0 %v2348_v6  ;;  %v2683_v6 = vsub.s32 2, %v2652_v17 }
  0x8f   : > { %1319 = vmatpush2.bf16.msra.mxu1 %v2351_v7  ;;  %1279 = vmatprep.subr.bf16.mxu0 %v2356_v8  ;;  %v2686_v7 = vsub.s32 3, %v2652_v17 }
  0x90   : > { %1320 = vmatprep.subr.bf16.mxu1 %v2359_v9 }
  0x92   : > { %1280 = vmatpush2.bf16.msra.mxu0 %v2354_v10 }
  0x93   : > { %1321 = vmatpush2.bf16.msra.mxu1 %v2357_v11 }
  0x95   : > { %1282 = vmatmul.mubr.bf16.vlgmr.msra.gmra.mxu0 %v2576_v12  ;;  %v2662_v12 = vld [vmem:[%s344_s15] sm:$0xf] }
  0x96   : > { %1323 = vmatmul.mubr.bf16.vlgmr.msra.gmra.mxu1 %v2578_v13  ;;  %v2665_v13 = vsub.s32 1, %v2652_v17  ;;  %v510_v19 = vrot.slane %v2662_v12, %v2655_v18  ;;  %v518_v8 = vrot.slane %v2662_v12, %v2683_v6  ;;  %v522_v9 = vrot.slane %v2662_v12, %v2686_v7 }
  0x98   : > { %v514_v20 = vrot.slane %v2662_v12, %v2665_v13 }
 0x115   : > { %v1201_v21 = vpop.f32.mrf.mxu0 }
 0x116   : > { %v1242_v22 = vpop.f32.mrf.mxu1  ;;  %v1202_v23 = vadd.f32 %v1201_v21, %v510_v19 }
 0x117   : > { %v1203_v24 = vpop.f32.mrf.mxu0 }
 0x118   : > { %v1244_v25 = vpop.f32.mrf.mxu1  ;;  %v1243_v26 = vadd.f32 %v1242_v22, %v1202_v23  ;;  %v1204_v27 = vadd.f32 %v1203_v24, %v514_v20 }
 0x119   : > { %v1205_v28 = vpop.f32.mrf.mxu0 }
 0x11a   : > { %v1246_v29 = vpop.f32.mrf.mxu1  ;;  %v1331_v30 = vrot.slane %v1243_v26, 4  ;;  %v1245_v31 = vadd.f32 %v1244_v25, %v1204_v27 }
 0x11b   : > { %v1206_v32 = vpop.f32.mrf.mxu0 }
 0x11c   : > { %v1247_v33 = vpop.f32.mrf.mxu1  ;;  %v1332_v34 = vadd.f32 %v1331_v30, %v1243_v26  ;;  %v1337_v35 = vrot.slane %v1245_v31, 4 }
 0x11e   : > { %v1333_v36 = vrot.slane %v1332_v34, 2  ;;  %v1338_v37 = vadd.f32 %v1337_v35, %v1245_v31 }
 0x120   : > { %v1334_v38 = vadd.f32 %v1333_v36, %v1332_v34  ;;  %v1339_v39 = vrot.slane %v1338_v37, 2 }
 0x122   : > { %v1335_v40 = vrot.slane %v1334_v38, 1  ;;  %v1340_v41 = vadd.f32 %v1339_v39, %v1338_v37 }
 0x124   : > { %v1336_v42 = vadd.f32 %v1335_v40, %v1334_v38  ;;  %v1341_v43 = vrot.slane %v1340_v41, 1 }
 0x126   : > { %v1356_v44 = vmul.f32 0.125, %v1336_v42  ;;  %v1342_v45 = vadd.f32 %v1341_v43, %v1340_v41 }
 0x128   : > { %v2671_v46 = vsub.f32 %v1243_v26, %v1356_v44  ;;  %v1357_v47 = vmul.f32 0.125, %v1342_v45 }
 0x12a   : > { %v1364_v48 = vmul.f32 %v2671_v46, %v2671_v46  ;;  %v2675_v49 = vsub.f32 %v1245_v31, %v1357_v47 }
 0x12c   : > { %v1368_v50 = vrot.slane %v1364_v48, 4  ;;  %v1365_v51 = vmul.f32 %v2675_v49, %v2675_v49 }
 0x12e   : > { %v1369_v52 = vadd.f32 %v1368_v50, %v1364_v48  ;;  %v1374_v53 = vrot.slane %v1365_v51, 4 }
 0x130   : > { %v1370_v54 = vrot.slane %v1369_v52, 2  ;;  %v1375_v55 = vadd.f32 %v1374_v53, %v1365_v51 }
 0x132   : > { %v1371_v56 = vadd.f32 %v1370_v54, %v1369_v52  ;;  %v1376_v57 = vrot.slane %v1375_v55, 2 }
 0x134   : > { %v1372_v58 = vrot.slane %v1371_v56, 1  ;;  %v1377_v59 = vadd.f32 %v1376_v57, %v1375_v55 }
 0x136   : > { %v1373_v60 = vadd.f32 %v1372_v58, %v1371_v56  ;;  %v1378_v61 = vrot.slane %v1377_v59, 1 }
 0x138   : > { %v1392_v62 = vmul.f32 0.125, %v1373_v60  ;;  %v1379_v63 = vadd.f32 %v1378_v61, %v1377_v59  ;;  %v2409_v61 = vmov 1966171168  }
 0x13a   : > { %v1397_v0 = vadd.f32 1e-05, %v1392_v62  ;;  %v1393_v1 = vmul.f32 0.125, %v1379_v63  ;;  %v1412_v62 = vunpack.c.l.s4 %v2409_v61 }
 0x13c   : > { %v1398_v2 = vadd.f32 1e-05, %v1393_v1  ;;  %2360 = vrsqrt.f32 %v1397_v0  ;;  %v1413_v63 = vunpack.c.0.s8 %v1412_v62 }
 0x13e   : > { %2362 = vrsqrt.f32 %v1398_v2  ;;  %v1416_v1 = vsub.s32 %v1413_v63, %v2652_v17 }
 0x149   : > { %v2679_v3 = vpop.eup %2360 }
 0x14b   : > { %v2363_v4 = vpop.eup %2362 }
 0x14c   : > { %v1409_v5 = vcombine.low %v2679_v3, %v2363_v4 }
 0x14e   : > { %v1417_v4 = vrot.slane %v1409_v5, %v1416_v1 }
 0x155   : > { %v1283_v10 = vpop.f32.mrf.mxu0 }
 0x156   : > { %v1324_v11 = vpop.f32.mrf.mxu1  ;;  %v1284_v14 = vadd.f32 %v1283_v10, %v518_v8  ;;  %v1396_v10 = vld [vmem:[%s348_s18] sm:$0xf] }
 0x157   : > { %v1285_v15 = vpop.f32.mrf.mxu0 }
 0x158   : > { %v1326_v16 = vpop.f32.mrf.mxu1  ;;  %v1325_v19 = vadd.f32 %v1324_v11, %v1284_v14  ;;  %v1286_v20 = vadd.f32 %v1285_v15, %v522_v9  ;;  %v1460_v14 = vld [vmem:[%s352_s21] sm:$0xf] }
 0x159   : > { %v1287_v21 = vpop.f32.mrf.mxu0  ;;  %v1469_v17 = vrot.slane %v1460_v14, %v2665_v13  ;;  %v1473_v5 = vrot.slane %v1460_v14, %v2683_v6 }
 0x15a   : > { %v1328_v22 = vpop.f32.mrf.mxu1  ;;  %v1343_v23 = vrot.slane %v1325_v19, 4  ;;  %v1327_v24 = vadd.f32 %v1326_v16, %v1286_v20  ;;  %v1465_v16 = vrot.slane %v1460_v14, %v2655_v18 }
 0x15b   : > { %v1288_v25 = vpop.f32.mrf.mxu0 }
 0x15c   : > { %v1329_v26 = vpop.f32.mrf.mxu1  ;;  %v1344_v27 = vadd.f32 %v1343_v23, %v1325_v19  ;;  %v1349_v28 = vrot.slane %v1327_v24, 4 }
 0x15e   : > { %v1345_v29 = vrot.slane %v1344_v27, 2  ;;  %v1350_v30 = vadd.f32 %v1349_v28, %v1327_v24  ;;  %v1498_v28 = vpop.permute.xlu0 %1497 }
 0x160   : > { %v1346_v31 = vadd.f32 %v1345_v29, %v1344_v27  ;;  %v1351_v32 = vrot.slane %v1350_v30, 2 }
 0x162   : > { %v1347_v12 = vrot.slane %v1346_v31, 1  ;;  %v1352_v33 = vadd.f32 %v1351_v32, %v1350_v30 }
 0x164   : > { %v1348_v34 = vadd.f32 %v1347_v12, %v1346_v31  ;;  %v1353_v35 = vrot.slane %v1352_v33, 1 }
 0x166   : > { %v1358_v36 = vmul.f32 0.125, %v1348_v34  ;;  %v1354_v37 = vadd.f32 %v1353_v35, %v1352_v33 }
 0x168   : > { %v1362_v38 = vsub.f32 %v1325_v19, %v1358_v36  ;;  %v1359_v39 = vmul.f32 0.125, %v1354_v37  ;;  %v1477_v19 = vrot.slane %v1460_v14, %v2686_v7 }
 0x16a   : > { %v1366_v40 = vmul.f32 %v1362_v38, %v1362_v38  ;;  %v1363_v41 = vsub.f32 %v1327_v24, %v1359_v39 }
 0x16c   : > { %v1380_v42 = vrot.slane %v1366_v40, 4  ;;  %v1367_v43 = vmul.f32 %v1363_v41, %v1363_v41 }
 0x16e   : > { %v1381_v44 = vadd.f32 %v1380_v42, %v1366_v40  ;;  %v1386_v45 = vrot.slane %v1367_v43, 4 }
 0x170   : > { %v1382_v47 = vrot.slane %v1381_v44, 2  ;;  %v1387_v48 = vadd.f32 %v1386_v45, %v1367_v43 }
 0x172   : > { %v1383_v50 = vadd.f32 %v1382_v47, %v1381_v44  ;;  %v1388_v51 = vrot.slane %v1387_v48, 2 }
 0x174   : > { %v1384_v52 = vrot.slane %v1383_v50, 1  ;;  %v1389_v53 = vadd.f32 %v1388_v51, %v1387_v48 }
 0x176   : > { %v1385_v54 = vadd.f32 %v1384_v52, %v1383_v50  ;;  %v1390_v55 = vrot.slane %v1389_v53, 1 }
 0x178   : > { %v1394_v56 = vmul.f32 0.125, %v1385_v54  ;;  %v1391_v57 = vadd.f32 %v1390_v55, %v1389_v53 }
 0x17a   : > { %v1399_v58 = vadd.f32 1e-05, %v1394_v56  ;;  %v1395_v59 = vmul.f32 0.125, %v1391_v57 }
 0x17c   : > { %v1400_v60 = vadd.f32 1e-05, %v1395_v59  ;;  %2364 = vrsqrt.f32 %v1399_v58 }
 0x17e   : > { %2366 = vrsqrt.f32 %v1400_v60 }
 0x189   : > { %v2365_v0 = vpop.eup %2364 }
 0x18b   : > { %v2367_v2 = vpop.eup %2366 }
 0x18c   : > { %v1410_v3 = vcombine.low %v2365_v0, %v2367_v2 }
 0x18e   : > { %v1424_v8 = vrot.slane %v1410_v3, %v1416_v1 }
 0x190   : > { %v1425_v9 = vcombine.low %v1417_v4, %v1424_v8 }
 0x192   : > { %v1432_v11 = vrot.slane %v1425_v9, %v1416_v1 }
 0x194   : > { %v1434_v15 = vmul.f32 %v1432_v11, %v1396_v10 }
 0x196   : > { %v1451_v20 = vrot.slane %v1434_v15, %v2686_v7  ;;  %v1439_v21 = vrot.slane %v1434_v15, %v2655_v18  ;;  %v1443_v22 = vrot.slane %v1434_v15, %v2665_v13  ;;  %v1447_v23 = vrot.slane %v1434_v15, %v2683_v6 }
 0x198   : > { %v1459_v24 = vmul.f32 %v1451_v20, %v1363_v41  ;;  %v1456_v25 = vmul.f32 %v1439_v21, %v2671_v46  ;;  %v1457_v26 = vmul.f32 %v1443_v22, %v2675_v49  ;;  %v1458_v27 = vmul.f32 %v1447_v23, %v1362_v38 }
 0x19a   : > { %v1482_v29 = vadd.f32 %v1465_v16, %v1456_v25  ;;  %v1483_v30 = vadd.f32 %v1469_v17, %v1457_v26  ;;  %v1484_v31 = vadd.f32 %v1473_v5, %v1458_v27  ;;  %v1485_v32 = vadd.f32 %v1477_v19, %v1459_v24 }
 0x19c   : > { %vm1487_vm0 = vcmp.ge.f32.partialorder %v1482_v29, 0.0  ;;  %vm1488_vm1 = vcmp.ge.f32.partialorder %v1483_v30, 0.0  ;;  %vm1489_vm2 = vcmp.ge.f32.partialorder %v1484_v31, 0.0  ;;  %vm1490_vm3 = vcmp.ge.f32.partialorder %v1485_v32, 0.0 }
 0x19d   : > { %v1500_v18 = vsel %vm1487_vm0, 1.0, %v1498_v28  ;;  %v1501_v7 = vsel %vm1488_vm1, 1.0, %v1498_v28  ;;  %v1502_v13 = vsel %vm1489_vm2, 1.0, %v1498_v28  ;;  %v1503_v12 = vsel %vm1490_vm3, 1.0, %v1498_v28  ;;  %1515 = sbr.rel (%p2076_p5) target bundleno = 654 (0x28e), region = 60 }
 0x19e   : > { %v2713_v6 = vmul.f32 %v1500_v18, %v1482_v29  ;;  %v1505_v33 = vmul.f32 %v1501_v7, %v1483_v30  ;;  %v2715_v46 = vmul.f32 %v1502_v13, %v1484_v31  ;;  %v1507_v49 = vmul.f32 %v1503_v12, %v1485_v32 }
 0x1a0   : > { %1508 = vst [vmem:[#allocation2 + $0x10] sm:$0xff] %v2713_v6  ;;  %1509 = vst [vmem:[#allocation2] sm:$0xff] %v1505_v33 }
 0x1a1   : > { %1510 = vst [vmem:[#allocation2 + $0x18] sm:$0xff] %v2715_v46  ;;  %1511 = vst [vmem:[#allocation2 + $0x8] sm:$0xff] %v1507_v49 }
 0x1a2   : > { %v2368_v34 = vld [vmem:[%s2835_s6 + $0x78] sm:$0xff]   ;;  %v1517_v35 = vpack.c.bf16 %v1505_v33, %v1505_v33  ;;  %v1519_v36 = vpack.c.bf16 %v1507_v49, %v1507_v49  ;;  %v2372_v40 = vld [vmem:[%s2835_s6 + $0x70] sm:$0xff]   ;;  %v2376_v44 = vld [vmem:[%s2835_s6 + $0x68] sm:$0xff]   ;;  %v1516_v9 = vpack.c.bf16 %v2713_v6, %v2713_v6  ;;  %v1518_v10 = vpack.c.bf16 %v2715_v46, %v2715_v46 }
 0x1a3   : > { %v2369_v37 = vld [vmem:[%s2835_s6 + $0xf8] sm:$0xff]   ;;  %2113 = vmatprep.subr.bf16.mxu0 %v2368_v34  ;;  %v2373_v41 = vld [vmem:[%s2835_s6 + $0xf0] sm:$0xff]   ;;  %v2377_v45 = vld [vmem:[%s2835_s6 + $0xe8] sm:$0xff]  }
 0x1a4   : > { %v2370_v38 = vld [vmem:[%s2835_s6 + $0x38] sm:$0xff]   ;;  %1815 = vmatprep.mubr.bf16.mxu0 %v1517_v35  ;;  %2135 = vmatprep.subr.bf16.mxu1 %v2369_v37  ;;  %v2374_v42 = vld [vmem:[%s2835_s6 + $0x30] sm:$0xff]   ;;  %v2378_v47 = vld [vmem:[%s2835_s6 + $0x28] sm:$0xff]  }
 0x1a5   : > { %v2371_v39 = vld [vmem:[%s2835_s6 + $0xb8] sm:$0xff]   ;;  %1855 = vmatprep.mubr.bf16.mxu1 %v1519_v36  ;;  %2114 = vmatpush3.bf16.msra.mxu0 %v2370_v38  ;;  %v2375_v43 = vld [vmem:[%s2835_s6 + $0xb0] sm:$0xff]   ;;  %v2379_v48 = vld [vmem:[%s2835_s6 + $0xa8] sm:$0xff]  }
 0x1a6   : > { %2136 = vmatpush3.bf16.msra.mxu1 %v2371_v39  ;;  %2115 = vmatprep.subr.bf16.mxu0 %v2372_v40  ;;  %v2380_v50 = vld [vmem:[%s2835_s6 + $0x60] sm:$0xff]   ;;  %v2384_v54 = vld [vmem:[%s2835_s6 + $0x58] sm:$0xff]   ;;  %v2388_v58 = vld [vmem:[%s2835_s6 + $0x50] sm:$0xff]  }
 0x1a7   : > { %2137 = vmatprep.subr.bf16.mxu1 %v2373_v41  ;;  %v2381_v51 = vld [vmem:[%s2835_s6 + $0xe0] sm:$0xff]   ;;  %v2385_v55 = vld [vmem:[%s2835_s6 + $0xd8] sm:$0xff]   ;;  %v2389_v59 = vld [vmem:[%s2835_s6 + $0xd0] sm:$0xff]  }
 0x1a8   : > { %v2382_v52 = vld [vmem:[%s2835_s6 + $0x20] sm:$0xff]   ;;  %v2386_v56 = vld [vmem:[%s2835_s6 + $0x18] sm:$0xff]   ;;  %v2390_v60 = vld [vmem:[%s2835_s6 + $0x10] sm:$0xff]  }
 0x1a9   : > { %2116 = vmatpush3.bf16.msra.mxu0 %v2374_v42  ;;  %v2383_v53 = vld [vmem:[%s2835_s6 + $0xa0] sm:$0xff]   ;;  %v2387_v57 = vld [vmem:[%s2835_s6 + $0x98] sm:$0xff]   ;;  %v2391_v61 = vld [vmem:[%s2835_s6 + $0x90] sm:$0xff]  }
 0x1aa   : > { %2138 = vmatpush3.bf16.msra.mxu1 %v2375_v43  ;;  %2117 = vmatprep.subr.bf16.mxu0 %v2376_v44  ;;  %v2392_v62 = vld [vmem:[%s2835_s6 + $0x48] sm:$0xff]   ;;  %v2396_v2 = vld [vmem:[%s2835_s6 + $0x40] sm:$0xff]  }
 0x1ab   : > { %2139 = vmatprep.subr.bf16.mxu1 %v2377_v45  ;;  %v2393_v63 = vld [vmem:[%s2835_s6 + $0xc8] sm:$0xff]   ;;  %v2397_v3 = vld [vmem:[%s2835_s6 + $0xc0] sm:$0xff]  }
 0x1ac   : > { %v2394_v0 = vld [vmem:[%s2835_s6 + $0x8] sm:$0xff]   ;;  %v2398_v4 = vld [vmem:[%s2835_s6] sm:$0xff]  }
 0x1ad   : > { %2118 = vmatpush3.bf16.msra.mxu0 %v2378_v47  ;;  %v2395_v1 = vld [vmem:[%s2835_s6 + $0x88] sm:$0xff]   ;;  %v2399_v8 = vld [vmem:[%s2835_s6 + $0x80] sm:$0xff]  }
 0x1ae   : > { %2140 = vmatpush3.bf16.msra.mxu1 %v2379_v48  ;;  %2119 = vmatprep.subr.bf16.mxu0 %v2380_v50  ;;  %v2077_v15 = vld [vmem:[%s2836_s7] ss:$0 sm:$0xff] }
 0x1af   : > { %2141 = vmatprep.subr.bf16.mxu1 %v2381_v51 }
 0x1b1   : > { %2120 = vmatpush3.bf16.msra.mxu0 %v2382_v52 }
 0x1b2   : > { %2142 = vmatpush3.bf16.msra.mxu1 %v2383_v53  ;;  %2121 = vmatprep.subr.bf16.mxu0 %v2384_v54 }
 0x1b3   : > { %2143 = vmatprep.subr.bf16.mxu1 %v2385_v55 }
 0x1b5   : > { %2122 = vmatpush3.bf16.msra.mxu0 %v2386_v56 }
 0x1b6   : > { %2144 = vmatpush3.bf16.msra.mxu1 %v2387_v57  ;;  %2123 = vmatprep.subr.bf16.mxu0 %v2388_v58 }
 0x1b7   : > { %2145 = vmatprep.subr.bf16.mxu1 %v2389_v59 }
 0x1b9   : > { %2124 = vmatpush3.bf16.msra.mxu0 %v2390_v60 }
 0x1ba   : > { %2146 = vmatpush3.bf16.msra.mxu1 %v2391_v61  ;;  %2125 = vmatprep.subr.bf16.mxu0 %v2392_v62 }
 0x1bb   : > { %2147 = vmatprep.subr.bf16.mxu1 %v2393_v63 }
 0x1bd   : > { %2126 = vmatpush3.bf16.msra.mxu0 %v2394_v0 }
 0x1be   : > { %2148 = vmatpush3.bf16.msra.mxu1 %v2395_v1  ;;  %2127 = vmatprep.subr.bf16.mxu0 %v2396_v2 }
 0x1bf   : > { %2149 = vmatprep.subr.bf16.mxu1 %v2397_v3 }
 0x1c1   : > { %2128 = vmatpush3.bf16.msra.mxu0 %v2398_v4 }
 0x1c2   : > { %2150 = vmatpush3.bf16.msra.mxu1 %v2399_v8 }
 0x1c4   : > { %1816 = vmatmul.mubr.bf16.vlgmr.msra.gmra.mxu0 %v1516_v9 }
 0x1c5   : > { %1856 = vmatmul.mubr.bf16.vlgmr.msra.gmra.mxu1 %v1518_v10 }
 0x284   : > { %v2129_v11 = vpop.f32.mrf.mxu0 }
 0x285   : > { %v2151_v14 = vpop.f32.mrf.mxu1 }
 0x286   : > { %v2130_v16 = vpop.f32.mrf.mxu0 }
 0x287   : > { %v2131_v17 = vadd.f32 %v2130_v16, %v2129_v11  ;;  %v2152_v5 = vpop.f32.mrf.mxu1 }
 0x288   : > { %v2132_v19 = vpop.f32.mrf.mxu0  ;;  %v2153_v21 = vadd.f32 %v2152_v5, %v2151_v14 }
 0x289   : > { %v1818_v20 = vadd.f32 %v2131_v17, %v2077_v15  ;;  %v2154_v22 = vpop.f32.mrf.mxu1 }
 0x28a   : > { %v2133_v23 = vpop.f32.mrf.mxu0 }
 0x28b   : > { %v1858_v24 = vadd.f32 %v2153_v21, %v1818_v20  ;;  %v2155_v25 = vpop.f32.mrf.mxu1 }
 0x28d   : > { %1863 = vst [vmem:[%s2837_s8] sm:$0xff] %v1858_v24 }
 0x28e PF: > { %s18_s27 = sadd.s32 1, %s2406_s27  }
 0x28f   : > { %p15_p6 = scmp.ge.s32.totalorder %s18_s27, 6  }
 0x291   :  { %17 = sbr.rel (!%p15_p6) target bundleno = 1 (0x1), region = 98 }

</bundles_post_ra>
